<compile_context>
chip_gen: v5e
topology: v5e:2x2
jax: 0.10.0
libtpu: 0.0.40
codegen_flags: <defaults>
</compile_context>

<pallas_src>
import functools

import numpy as np
import jax
import jax.numpy as jnp
from jax import lax
from jax.experimental import pallas as pl
from jax.experimental.pallas import tpu as pltpu

# ----------------------------- static config -------------------------------
B = 2               # batch
IMG = 24            # input image spatial size (H == W required by y_glcm)
C_IN = 3
PATCH = 4           # stand-in feature-extractor patch size -> 6x6 feature map
FH = IMG // PATCH   # 6
FW = IMG // PATCH   # 6
CH = 256            # `channels`
GROUPS = 32         # `factor`
CG = CH // GROUPS   # 8 channels per group
HW = FH * FW        # 36
NGHW = GROUPS * HW  # 1152 = 9 * 128  (lane-dense flattened group*spatial axis)
NUM_CLASSES = 117
FC1_PAD = 128       # lane-dense padded fc_1 output width
KSTACK = 9 * CG + CG  # 80: 9 conv taps + group_y_glcm rows of the K-slab

# ---------------- compile-time constants for the fusion kernel --------------
# segment-mean / segment-broadcast operators (per-instance pooling over HW is
# done on the MXU so no in-kernel reshapes of the (8, 1152) tiles are needed).
_SEG = np.repeat(np.arange(GROUPS), HW)
_BCAST_NP = (np.arange(GROUPS)[:, None] == _SEG[None, :]).astype(np.float32)  # (G, NGHW)
_POOL_NP = (_BCAST_NP.T / float(HW)).astype(np.float32)                       # (NGHW, G)
# 3x3 conv tap validity masks (zero padding) for the flattened 6x6 maps.
_pos = np.arange(NGHW)
_row = (_pos % HW) // FW
_col = (_pos % HW) % FW
_MASKS_NP = np.zeros((9, 1, NGHW), np.float32)
_TAP_OFFSET = []
for _k in range(9):
    _dh, _dw = _k // 3 - 1, _k % 3 - 1
    _ok = ((_row + _dh >= 0) & (_row + _dh < FH)
           & (_col + _dw >= 0) & (_col + _dw < FW))
    _MASKS_NP[_k, 0] = _ok.astype(np.float32)
    _TAP_OFFSET.append(_dh * FW + _dw)

# Invariant relied on by the rolled-tap conv: whenever a tap is UNMASKED at
# flattened position p, the source position p + offset is
#   g*HW + (row+dh)*FW + (col+dw)  with 0 <= row+dh < FH, 0 <= col+dw < FW,
# i.e. it stays inside the SAME 36-lane group segment (and inside [0, NGHW)),
# so lane rolls can never leak data across group or array boundaries.
assert all(abs(_o) <= FW + 1 < HW for _o in _TAP_OFFSET)


# ----------------------- generic linear Pallas kernel ----------------------
def _linear_kernel(x_ref, w_ref, b_ref, o_ref, *, relu):
    y = jnp.dot(x_ref[...], w_ref[...], preferred_element_type=jnp.float32)
    y = y + b_ref[...]
    if relu:
        y = jnp.maximum(y, 0.0)
    o_ref[...] = y


def pallas_linear(x, w, b, relu=False, block_n=None):
    m, k = x.shape
    k2, n = w.shape
    assert k == k2
    if block_n is None:
        block_n = n
    assert n % block_n == 0
    return pl.pallas_call(
        functools.partial(_linear_kernel, relu=relu),
        out_shape=jax.ShapeDtypeStruct((m, n), jnp.float32),
        grid=(n // block_n,),
        in_specs=[pl.BlockSpec((m, k), lambda i: (0, 0)),
                  pl.BlockSpec((k, block_n), lambda i: (0, i)),
                  pl.BlockSpec((1, block_n), lambda i: (0, i))],
        out_specs=pl.BlockSpec((m, block_n), lambda i: (0, i)),
        compiler_params=pltpu.CompilerParams(
            dimension_semantics=("parallel",)),
    )(x, w, b.reshape(1, n))


# ------------------- fused y_glcm branch (cov + conv3x3) --------------------
def _glcm_kernel(yt_ref, bR_ref, wl_ref, bg_ref, o_ref, stk_ref):
    """Covariance + 3x3 conv of the y_glcm branch in one kernel.

    yt_ref holds the image spatially TRANSPOSED so that
        cov = a_t @ a_t  (a_t = centered transposed channel)
    equals einsum('ikj,ilk->ijl') with only standard-orientation matmuls.
    The 3x3 conv (zero padding) is a shift-matrix sandwich:
        out[o] = bg[o] + sum_{c,kw} WL[o,c,kw] @ (cov_c @ B_kw)
    with B_kw / WL precomputed at init (kh folded into WL).
    """
    f32 = jnp.float32
    inv = 1.0 / float(IMG * IMG - 1)
    for c in range(C_IN):
        at = yt_ref[0, c]                       # (S, S), spatially transposed
        at = at - jnp.mean(at)
        cov = jnp.dot(at, at, preferred_element_type=f32) * inv
        stk_ref[pl.ds((3 * c + 0) * IMG, IMG), :] = jnp.dot(
            cov, bR_ref[0], preferred_element_type=f32)      # kw = 0
        stk_ref[pl.ds((3 * c + 1) * IMG, IMG), :] = cov      # kw = 1 (identity)
        stk_ref[pl.ds((3 * c + 2) * IMG, IMG), :] = jnp.dot(
            cov, bR_ref[1], preferred_element_type=f32)      # kw = 2
    pstack = stk_ref[...]                                    # (9*S, S)
    for o in range(C_IN):
        o_ref[0, o] = (jnp.dot(wl_ref[o], pstack, preferred_element_type=f32)
                       + bg_ref[o])


def glcm_branch(yt_img, p):
    vec4 = lambda i: (i, 0, 0, 0)
    full3 = lambda i: (0, 0, 0)
    return pl.pallas_call(
        _glcm_kernel,
        out_shape=jax.ShapeDtypeStruct((B, C_IN, IMG, IMG), jnp.float32),
        grid=(B,),
        in_specs=[pl.BlockSpec((1, C_IN, IMG, IMG), vec4),    # y (transposed)
                  pl.BlockSpec((2, IMG, IMG), full3),         # right shift mats
                  pl.BlockSpec((C_IN, IMG, 9 * IMG), full3),  # combined left w
                  pl.BlockSpec((C_IN, 1), lambda i: (0, 0))], # conv bias
        out_specs=pl.BlockSpec((1, C_IN, IMG, IMG), vec4),
        scratch_shapes=[pltpu.VMEM((9 * IMG, IMG), jnp.float32)],
        compiler_params=pltpu.CompilerParams(
            dimension_semantics=("parallel",)),
    )(yt_img, p['bR'], p['wl'], p['bg2'])


# ------------------------------- glue helpers -------------------------------
def _patchify(imgs):
    """(N, 3, 24, 24) -> (N*36, 48) patch matrix (shared by kernel & reference)."""
    n = imgs.shape[0]
    p = imgs.reshape(n, C_IN, FH, PATCH, FW, PATCH)
    p = p.transpose(0, 2, 4, 1, 3, 5)
    return p.reshape(n * FH * FW, C_IN * PATCH * PATCH)


def feature_extractor(imgs, w_fe, b_fe):
    """Deterministic AlexNet-features stand-in: (N,3,24,24) -> (N,256,6,6)."""
    n = imgs.shape[0]
    # N=256 split into 2x128 lane-aligned "parallel" blocks (v7x: both cores).
    f = pallas_linear(_patchify(imgs), w_fe, b_fe, relu=True, block_n=128)
    return f.reshape(n, FH, FW, CH).transpose(0, 3, 1, 2)     # NCHW


# -------------------------- DHA fusion Pallas kernel ------------------------
def _fusion_kernel(gx_ref, gy_ref, ggl_ref, gxa_ref, gym_ref,
                   pool_ref, bcast_ref, masks_ref,
                   wstk_ref, bcc_ref, w0a_ref, w0b_ref, wf1_ref, wf2_ref,
                   gamma_ref, beta_ref, out_ref, stack_ref, *, shifts):
    f32 = jnp.float32

    def mm(a, b):
        return jnp.dot(a, b, preferred_element_type=f32)

    gy = gy_ref[0]                      # (CG, NGHW) lane-dense (1152 = 9*128)

    # pooled, spatially-constant branches on (CG, 32) columns
    gy_avg = mm(gy, pool_ref[...])      # avg_pool(group_y) as MXU segment-mean
    xfc = jax.nn.sigmoid(
        mm(w0b_ref[...], jnp.maximum(mm(w0a_ref[...], gxa_ref[0]), 0.0)))

    def fc_block(v):                    # self.fc : 1x1 conv -> ReLU -> 1x1 conv
        return mm(wf2_ref[...], jnp.maximum(mm(wf1_ref[...], v), 0.0))

    avg_out = fc_block(gy_avg)
    max_out = fc_block(gym_ref[0])

    # conv3x3(group_y) folded with channel_compress: write the 9 masked
    # lane-rolled taps of gy plus group_y_glcm into one (80, NGHW) K-slab in
    # VMEM, then a single (CG, 80) x (80, NGHW) MXU matmul produces cc.
    for k in range(9):
        tap = gy if shifts[k] == 0 else pltpu.roll(gy, shifts[k], 1)
        stack_ref[pl.ds(k * CG, CG), :] = tap * masks_ref[k]
    stack_ref[pl.ds(9 * CG, CG), :] = ggl_ref[0]
    cc = mm(wstk_ref[...], stack_ref[...]) + bcc_ref[...]
    glcm_out = fc_block(cc)

    # gate + GroupNorm(CG, CG): per-(channel, group-instance) stats over HW,
    # pooled / broadcast via the resident pool / bcast operators on the MXU.
    gate = jax.nn.sigmoid(glcm_out + mm(avg_out + max_out, bcast_ref[...]))
    yg = gy * gate
    mu = mm(yg, pool_ref[...])                               # (CG, G)
    d = yg - mm(mu, bcast_ref[...])
    var = mm(d * d, pool_ref[...])                           # (CG, G)
    scale = gamma_ref[...] * lax.rsqrt(var + 1e-5)           # (CG, G)
    y1 = d * mm(scale, bcast_ref[...]) + beta_ref[...]       # (CG, NGHW)

    # cross attention over the channel axis
    a11 = jax.nn.softmax(xfc, axis=0)                        # (CG, G)
    a21 = jax.nn.softmax(mm(y1, pool_ref[...]), axis=0)      # (CG, G)
    w_row = jnp.sum(mm(a11, bcast_ref[...]) * y1 + mm(a21 * xfc, bcast_ref[...]),
                    axis=0, keepdims=True)                   # (1, NGHW)
    sig = jax.nn.sigmoid(w_row)
    # group_x is only needed here; deferring its load keeps vreg pressure low.
    out_ref[0] = ((gx_ref[0] + gy) * sig).astype(out_ref.dtype)


def fusion(gx, gy, ggl, gx_avg, gy_max, p, shifts):
    vec = lambda i: (i, 0, 0)
    full2 = lambda i: (0, 0)
    full3 = lambda i: (0, 0, 0)
    return pl.pallas_call(
        functools.partial(_fusion_kernel, shifts=shifts),
        out_shape=jax.ShapeDtypeStruct((B, CG, NGHW), jnp.bfloat16),
        grid=(B,),
        in_specs=[
            pl.BlockSpec((1, CG, NGHW), vec),      # group_x
            pl.BlockSpec((1, CG, NGHW), vec),      # group_y
            pl.BlockSpec((1, CG, NGHW), vec),      # group_y_glcm
            pl.BlockSpec((1, CG, GROUPS), vec),    # avg_pool(group_x)
            pl.BlockSpec((1, CG, GROUPS), vec),    # max_pool(group_y)
            pl.BlockSpec((NGHW, GROUPS), full2),   # segment-mean operator
            pl.BlockSpec((GROUPS, NGHW), full2),   # segment-broadcast operator
            pl.BlockSpec((9, 1, NGHW), full3),     # conv tap validity masks
            pl.BlockSpec((CG, KSTACK), full2),     # folded conv+cc weights
            pl.BlockSpec((CG, 1), full2),          # folded conv+cc bias
            pl.BlockSpec((CG, CG), full2),         # fc_0 linear 1
            pl.BlockSpec((CG, CG), full2),         # fc_0 linear 2
            pl.BlockSpec((CG, CG), full2),         # fc conv1
            pl.BlockSpec((CG, CG), full2),         # fc conv2
            pl.BlockSpec((CG, 1), full2),          # GroupNorm gamma
            pl.BlockSpec((CG, 1), full2),          # GroupNorm beta
        ],
        out_specs=pl.BlockSpec((1, CG, NGHW), vec),
        scratch_shapes=[pltpu.VMEM((KSTACK, NGHW), jnp.float32)],
        compiler_params=pltpu.CompilerParams(
            dimension_semantics=("parallel",)),
    )(gx, gy, ggl, gx_avg, gy_max,
      jnp.asarray(_POOL_NP), jnp.asarray(_BCAST_NP), jnp.asarray(_MASKS_NP),
      p['wstk'], p['bcc_eff'], p['w0a'], p['w0b'], p['wf1'], p['wf2'],
      p['gamma'], p['beta'])


# ------------------------------- full forward -------------------------------
def dha_net_forward(params, x_img, y_img, *, shifts):
    # y_glcm branch (covariance + conv3x3) fused into a single kernel.
    ygc = glcm_branch(jnp.swapaxes(y_img, 2, 3), params)            # (B,3,24,24)

    # shared feature extractor: one batched Pallas matmul for x, y, y_glcm
    feats = feature_extractor(jnp.concatenate([x_img, y_img, ygc], axis=0),
                              params['wfe'], params['bfe'])         # (3B,256,6,6)
    x, y, ygl = feats[:B], feats[B:2 * B], feats[2 * B:]

    # lane-dense per-group layout (B, CG, GROUPS*HW) + tiny host poolings
    def grp(t):
        t4 = t.reshape(B, GROUPS, CG, HW).transpose(0, 2, 1, 3)     # (B,CG,G,HW)
        return t4.reshape(B, CG, NGHW), t4

    gx, gx4 = grp(x)
    gy, gy4 = grp(y)
    ggl, _ = grp(ygl)
    gx_avg = jnp.mean(gx4, axis=-1)          # avg_pool(group_x)  (B,CG,G)
    gy_max = jnp.max(gy4, axis=-1)           # max_pool(group_y)  (B,CG,G)

    fused = fusion(gx, gy, ggl, gx_avg, gy_max, params, shifts)     # bf16

    # fc_1: weight rows were permuted at init to the fused layout -> plain
    # reshape (no transpose), bf16 weight/activation, f32 accumulation.
    feat = fused.reshape(B, CG * NGHW)
    # nn.Dropout(p=0.6): identity at inference time
    logits = pallas_linear(feat, params['w1p'], params['b1p'])[:, :NUM_CLASSES]
    return logits


# ----------------------- pure-JAX reference (no Pallas) ----------------------
def ref_forward(params, x_img, y_img):
    hp = lax.Precision.HIGHEST

    yc = y_img - jnp.mean(y_img, axis=(2, 3), keepdims=True)
    cov = jnp.einsum('bikj,bilk->bijl', yc, yc, precision=hp) / (IMG * IMG - 1)
    ygc = lax.conv_general_dilated(
        cov, params['wg'], (1, 1), 'SAME',
        dimension_numbers=('NCHW', 'OIHW', 'NCHW'),
        precision=hp) + params['bg'].reshape(1, C_IN, 1, 1)

    def fe(img):
        n = img.shape[0]
        f = jnp.maximum(jnp.dot(_patchify(img), params['wfe'], precision=hp)
                        + params['bfe'], 0.0)
        return f.reshape(n, FH, FW, CH).transpose(0, 3, 1, 2)

    x, y, ygl = fe(x_img), fe(y_img), fe(ygc)
    gx = x.reshape(B * GROUPS, CG, FH, FW)
    gy = y.reshape(B * GROUPS, CG, FH, FW)
    ggl = ygl.reshape(B * GROUPS, CG, FH, FW)

    xfc = jax.nn.sigmoid(
        jnp.maximum(jnp.mean(gx, axis=(2, 3)) @ params['w0a'].T, 0.0)
        @ params['w0b'].T)                                          # (BG, CG)

    conv_y = lax.conv_general_dilated(
        gy, params['wc3'], (1, 1), 'SAME',
        dimension_numbers=('NCHW', 'OIHW', 'NCHW'),
        precision=hp) + params['bc3'].reshape(1, CG, 1, 1)
    cc = (jnp.einsum('oc,bchw->bohw', params['wcca'], conv_y, precision=hp)
          + jnp.einsum('oc,bchw->bohw', params['wccb'], ggl, precision=hp)
          + params['bcc'].reshape(1, CG, 1, 1))

    def fcb(v):
        h = jnp.maximum(jnp.einsum('oc,bc...->bo...', params['wf1'], v,
                                   precision=hp), 0.0)
        return jnp.einsum('oc,bc...->bo...', params['wf2'], h, precision=hp)

    glcm_out = fcb(cc)
    avg_out = fcb(jnp.mean(gy, axis=(2, 3)))[:, :, None, None]
    max_out = fcb(jnp.max(gy, axis=(2, 3)))[:, :, None, None]
    yg = gy * jax.nn.sigmoid(avg_out + max_out + glcm_out)

    mu = jnp.mean(yg, axis=(2, 3), keepdims=True)
    var = jnp.mean((yg - mu) ** 2, axis=(2, 3), keepdims=True)
    y1 = (params['gamma'].reshape(1, CG, 1, 1) * (yg - mu) / jnp.sqrt(var + 1e-5)
          + params['beta'].reshape(1, CG, 1, 1))

    a11 = jax.nn.softmax(xfc, axis=1)
    a21 = jax.nn.softmax(jnp.mean(y1, axis=(2, 3)), axis=1)
    w = (jnp.einsum('bc,bchw->bhw', a11, y1, precision=hp)
         + jnp.einsum('bc,bc->b', a21, xfc, precision=hp)[:, None, None])
    sig = jax.nn.sigmoid(w)[:, None]
    fused = (gx + gy) * sig

    feat = fused.reshape(B, CH * FH * FW)
    return jnp.dot(feat, params['w1'], precision=hp) + params['b1']


# ------------------------- deterministic parameters --------------------------
def init_params(key):
    ks = jax.random.split(key, 17)
    hp = lax.Precision.HIGHEST

    def g(k, shape, s=0.1):
        return jax.random.normal(k, shape, jnp.float32) * s

    p = {}
    p['wg'] = g(ks[0], (C_IN, C_IN, 3, 3))                  # y_glcm conv3x3 (OIHW)
    p['bg'] = g(ks[1], (C_IN,), 0.01)
    p['wfe'] = g(ks[2], (C_IN * PATCH * PATCH, CH))         # feature stand-in
    p['bfe'] = g(ks[3], (CH,), 0.01)
    p['w0a'] = g(ks[4], (CG, CG))                           # fc_0 Linear 1 (no bias)
    p['w0b'] = g(ks[5], (CG, CG))                           # fc_0 Linear 2 (no bias)
    p['wc3'] = g(ks[6], (CG, CG, 3, 3))                     # conv3x3 (OIHW)
    p['bc3'] = g(ks[7], (CG, 1), 0.01)
    p['wcca'] = g(ks[8], (CG, CG))                          # channel_compress[:, :CG]
    p['wccb'] = g(ks[9], (CG, CG))                          # channel_compress[:, CG:]
    p['bcc'] = g(ks[10], (CG, 1), 0.01)
    p['wf1'] = g(ks[11], (CG, CG))                          # fc 1x1 (no bias)
    p['wf2'] = g(ks[12], (CG, CG))
    # GroupNorm affine (torch default is ones/zeros; small noise added so the
    # reference check actually exercises the affine path)
    p['gamma'] = 1.0 + g(ks[13], (CG, 1))
    p['beta'] = g(ks[14], (CG, 1))
    p['w1'] = g(ks[15], (CH * HW, NUM_CLASSES), 0.02)       # fc_1
    p['b1'] = g(ks[16], (NUM_CLASSES,), 0.01)

    # ---------------- derived, kernel-layout params (init-time folding) -----
    # (a) channel_compress folded into the conv3x3 taps: one (CG, 80) weight
    #     acting on the stacked [9 taps of group_y ; group_y_glcm] K-slab.
    taps = [jnp.dot(p['wcca'], p['wc3'][:, :, k // 3, k % 3], precision=hp)
            for k in range(9)]
    p['wstk'] = jnp.concatenate(taps + [p['wccb']], axis=1)          # (CG, 80)
    p['bcc_eff'] = jnp.dot(p['wcca'], p['bc3'], precision=hp) + p['bcc']
    # (b) y_glcm conv as a shift-matrix sandwich: right shift mats for kw=0,2
    #     and left weights with kh pre-folded:  WL[o,c,kw] = sum_kh wg * eye(k=kh-1)
    A = np.stack([np.eye(IMG, k=kh - 1, dtype=np.float32) for kh in range(3)])
    wl = jnp.einsum('ochw,hij->ocwij', p['wg'], jnp.asarray(A), precision=hp)
    p['wl'] = wl.transpose(0, 3, 1, 2, 4).reshape(C_IN, IMG, 9 * IMG)
    p['bR'] = jnp.asarray(np.stack([np.eye(IMG, k=1, dtype=np.float32),
                                    np.eye(IMG, k=-1, dtype=np.float32)]))
    p['bg2'] = p['bg'].reshape(C_IN, 1)
    # (c) fc_1 weight: rows permuted to the fused (CG, G, HW) layout so the
    #     fusion output feeds fc_1 with a plain reshape; padded 117 -> 128 and
    #     stored bf16 (halves the largest HBM transfer of the network).
    idx = np.arange(CH * HW).reshape(GROUPS, CG, HW).transpose(1, 0, 2).reshape(-1)
    w1p = jnp.pad(p['w1'][jnp.asarray(idx)],
                  ((0, 0), (0, FC1_PAD - NUM_CLASSES)))
    p['w1p'] = w1p.astype(jnp.bfloat16)
    p['b1p'] = jnp.pad(p['b1'], (0, FC1_PAD - NUM_CLASSES))
    return p


# --------------- one-off probe for pltpu.roll rotation direction -------------
def _probe_roll_convention():
    """Return per-tap lane-roll amounts so rolled[:, p] == x[:, (p + off) % N]."""
    def k(x_ref, o_ref):
        o_ref[...] = pltpu.roll(x_ref[...], 1, 1)

    x = jnp.tile(jnp.arange(128, dtype=jnp.float32)[None, :], (8, 1))
    y = pl.pallas_call(
        k, out_shape=jax.ShapeDtypeStruct((8, 128), jnp.float32))(x)
    probe = float(y[0, 1])
    if probe == 0.0:        # jnp.roll convention: out[i] = x[i - shift]
        return tuple((-off) % NGHW for off in _TAP_OFFSET)
    if probe == 2.0:        # opposite convention: out[i] = x[i + shift]
        return tuple(off % NGHW for off in _TAP_OFFSET)
    raise RuntimeError("unexpected pltpu.roll semantics")


if __name__ == "__main__":
    key = jax.random.PRNGKey(0)
    kx, ky, kp = jax.random.split(key, 3)
    x_img = jax.random.normal(kx, (B, C_IN, IMG, IMG), jnp.float32)
    y_img = jax.random.normal(ky, (B, C_IN, IMG, IMG), jnp.float32)
    params = init_params(kp)

    shifts = _probe_roll_convention()
    fwd = jax.jit(functools.partial(dha_net_forward, shifts=shifts))
    out = fwd(params, x_img, y_img)
    jax.block_until_ready(out)

    assert out.shape == (B, NUM_CLASSES)
    assert bool(jnp.all(jnp.isfinite(out)))

    # semantics guard: compare against the pure-JAX reference of the module
    # (kernel uses default-precision f32 MXU matmuls + bf16 fc_1 weights; the
    # reference is Precision.HIGHEST f32, hence the loose-but-bug-catching tol)
    ref = jax.jit(ref_forward)(params, x_img, y_img)
    err = float(jnp.max(jnp.abs(out - ref)))
    assert err < 5e-2, f"kernel/reference mismatch: max abs err = {err}"
    print("KERNEL_OK")
</pallas_src>

<mosaic_0001>
module attributes {stable_mosaic.version = 11 : i64} {
  func.func @k(%arg0: memref<8x128xf32, #tpu.memory_space<vmem>>, %arg1: memref<8x128xf32, #tpu.memory_space<vmem>>) attributes {dimension_semantics = [], scalar_prefetch = 0 : i64, scratch_operands = 0 : i64, tpu.core_type = #tpu.core_type<tc>} {
    %c0 = arith.constant 0 : index
    %c0_0 = arith.constant 0 : index
    %0 = vector.load %arg0[%c0, %c0_0] : memref<8x128xf32, #tpu.memory_space<vmem>>, vector<8x128xf32>
    %c1_i32 = arith.constant 1 : i32
    %1 = tpu.dynamic_rotate %0 by %c1_i32 dim 1 : vector<8x128xf32>, i32 -> vector<8x128xf32>
    %c0_1 = arith.constant 0 : index
    %c0_2 = arith.constant 0 : index
    %2 = vector.load %arg1[%c0_1, %c0_2] : memref<8x128xf32, #tpu.memory_space<vmem>>, vector<8x128xf32>
    tpu.vector_store %arg1[%c0_1, %c0_2], %1 {strides = array<i32>} : memref<8x128xf32, #tpu.memory_space<vmem>>, vector<8x128xf32>,
    return
  }
}

</mosaic_0001>

<bundles_post_ra>
// kernel: tpu_custom_call.1
= control target key start
LH: loop header
LB: loop body
LE: loop exit
PB: predicated region body
PF: predicated region fallthrough
CT: control target
= control target key end

     0   :  { %6 = vsyncpa [#allocation3], 0  ;;  %s118_s0 = inlined_call_operand.hbm [shape: f32[8,128], index: 0, kind: input, shape index: {}]   ;;  %s119_s1 = inlined_call_operand.hbm [shape: f32[8,128], index: 1, kind: output, shape index: {}]  }
   0x1   :  { %7 = vsyncpa [#allocation4], 0  ;;  %s13_s8 = sshll.u32 %s118_s0, 4  ;;  %s99_s9 = smov [#allocation2]   ;;  %s14_s8 = int_to_ptr.hbm [resolvable:$true] %s13_s8 }
   0x2   :  { %s15_s10 = sshll.u32 %s99_s9, 4  ;;  %s16_s10 = int_to_ptr.vmem [resolvable:$true] %s15_s10 }
   0x3   :  { %18 = dma.hbm_to_vmem [thread:$0]  %s14_s8, 128, %s16_s10, [#allocation3]  }
   0x4   :  { %95 = dma.done.wait [#allocation3], 128  }
   0x5   :  { %96 = vsyncadd [#allocation3], 4294967168  ;;  %v23_v0 = vld [vmem:[#allocation2] sm:$0xff]  ;;  %s100_s11 = smov 1   ;;  %s101_s12 = smov [#allocation5]  }
   0x6   :  { %24 = vrot.lane.b32.xlu0 %v23_v0, %s100_s11  ;;  %s32_s13 = sshll.u32 %s101_s12, 4  ;;  %s34_s16 = sshll.u32 %s119_s1, 4  ;;  %s33_s13 = int_to_ptr.vmem [resolvable:$true] %s32_s13  ;;  %s35_s16 = int_to_ptr.hbm [resolvable:$true] %s34_s16 }
  0x78   :  { %v25_v1 = vpop.permute.xlu0 %24 }
  0x79   :  { %26 = vst [vmem:[#allocation5] sm:$0xff] %v25_v1 }
  0x7a   :  { %37 = dma.vmem_to_hbm [thread:$0]  %s33_s13, 128, %s35_s16, [#allocation4]  }
  0x7b   :  { %97 = dma.done.wait [#allocation4], 128  }
  0x7c   :  { %98 = vsyncadd [#allocation4], 4294967168 }
  0x7d   :  { %42 = vsyncpa [#allocation3], 1 }
  0x7e   :  { %43 = vsyncpa [#allocation4], 1 }

</bundles_post_ra>
